<compile_context>
chip_gen: v5e
topology: v5e:2x2
jax: 0.10.0
libtpu: 0.0.40
codegen_flags: <defaults>
</compile_context>

<pallas_src>
import jax
import jax.numpy as jnp
from jax.experimental import pallas as pl
from jax.experimental.pallas import tpu as pltpu

N_EMBED = 128      # router hidden size (matches the module's nn.Linear(128, 8))
NUM_EXPERTS = 8
TOP_K = 2


def _round_up(v, m):
    return (v + m - 1) // m * m


def topk_router_kernel(x_ref, w_ref, b_ref, probs_ref, idx_ref):
    """x:(tile_n,D)  w:(E,D)  b:(E,1)  ->  probs:(E,tile_n) f32, idx:(TOP_K,tile_n) i32."""
    # Expert-major logits: contract dim 1 of both operands on the MXU.
    nt_dims = (((1,), (1,)), ((), ()))
    logits = jax.lax.dot_general(
        w_ref[...], x_ref[...], nt_dims, preferred_element_type=jnp.float32
    ) + b_ref[...]                                                   # (E, tile_n)

    num_e = logits.shape[0]
    # Expert id per sublane, in f32 so the tie-break reductions stay float.
    row = jax.lax.broadcasted_iota(jnp.int32, logits.shape, 0).astype(jnp.float32)

    # Top-2 via iterative argmax; first occurrence wins ties (torch.topk order).
    m1 = jnp.max(logits, axis=0, keepdims=True)                      # (1, tile_n)
    i1 = jnp.min(jnp.where(logits == m1, row, float(num_e)), axis=0, keepdims=True)
    masked = jnp.where(row == i1, -jnp.inf, logits)
    m2 = jnp.max(masked, axis=0, keepdims=True)
    i2 = jnp.min(jnp.where(masked == m2, row, float(num_e)), axis=0, keepdims=True)

    # Softmax over the -inf scatter, closed form for top-2.
    e2 = jnp.exp(m2 - m1)
    p1 = 1.0 / (1.0 + e2)
    p2 = e2 * p1

    probs_ref[...] = jnp.where(
        row == i1, p1, jnp.where(row == i2, p2, 0.0)
    ).astype(probs_ref.dtype)

    # Both expert indices in one lane-dense store.
    krow = jax.lax.broadcasted_iota(jnp.int32, idx_ref.shape, 0)      # (TOP_K, tile_n)
    idx_ref[...] = jnp.where(krow == 0, i1, i2).astype(jnp.int32)


def _default_tile_n():
    """Per-generation token tile: big enough to amortise the ~0.35 us step overhead,
    small enough to fit the default scoped VMEM without an override."""
    kind = ""
    try:
        kind = jax.devices()[0].device_kind.lower()
    except Exception:
        pass
    if "v6" in kind or "v7" in kind:
        return 16384   # ~17 MiB double-buffered working set, under the 32 MiB default
    return 8192        # ~8.7 MiB, under the 16 MiB default on v4/v5-class chips


def topk_router(x, w, b, *, tile_n=None, expert_major_out=False):
    """x: (B, T, n_embed); w: (num_experts, n_embed); b: (num_experts,)."""
    B, T, D = x.shape
    E = w.shape[0]
    N = B * T

    x2 = x.reshape(N, D)                                 # view, no HBM copy
    w2 = jnp.asarray(w, dtype=x2.dtype)                  # match x dtype (bf16 OK)
    b2 = jnp.asarray(b, dtype=jnp.float32).reshape(E, 1)

    # Pad the hidden dim to a lane multiple (no-op for D = 128).
    D_pad = _round_up(D, 128)
    if D_pad != D:
        x2 = jnp.pad(x2, ((0, 0), (0, D_pad - D)))
        w2 = jnp.pad(w2, ((0, 0), (0, D_pad - D)))

    if tile_n is None:
        tile_n = _default_tile_n()

    # Tile the token axis in 128-row blocks.  No HBM padding of x: the grid uses
    # cdiv and Pallas clips the ragged last block.  Cap the tile at ceil(N/2) so
    # the grid has >= 2 steps whenever possible (both v7x TensorCores work).
    nb = pl.cdiv(N, 128)                     # token extent in 128-row blocks
    tb = max(1, min(max(tile_n, 128) // 128, nb))
    if nb >= 2:
        tb = min(tb, pl.cdiv(nb, 2))
    tile_n = tb * 128
    grid = (pl.cdiv(N, tile_n),)

    itemsize = jnp.dtype(x2.dtype).itemsize
    cost = pl.CostEstimate(
        flops=2 * N * D_pad * E,
        transcendentals=N,
        bytes_accessed=itemsize * (N * D_pad + E * D_pad)
        + 4 * (E + E * N + TOP_K * N),
    )

    # Per-step VMEM: double-buffered x tile + both (small) output tiles + w, b.
    vmem_bytes = (
        2 * tile_n * (D_pad * itemsize + E * 4 + TOP_K * 4)
        + 2 * (E * D_pad * itemsize + E * 4)
    )
    compiler_kwargs = dict(dimension_semantics=("parallel",))
    if vmem_bytes > 28 * 1024 * 1024:
        # Only triggered by caller-supplied oversized tiles; defaults fit the
        # per-generation scoped-VMEM defaults without any override.
        compiler_kwargs["vmem_limit_bytes"] = int(vmem_bytes * 1.25)

    probs_t, idx_t = pl.pallas_call(
        topk_router_kernel,
        out_shape=(
            jax.ShapeDtypeStruct((E, N), jnp.float32),
            jax.ShapeDtypeStruct((TOP_K, N), jnp.int32),
        ),
        grid_spec=pltpu.PrefetchScalarGridSpec(
            num_scalar_prefetch=0,
            grid=grid,
            in_specs=[
                pl.BlockSpec((tile_n, D_pad), lambda i: (i, 0)),
                pl.BlockSpec((E, D_pad), lambda i: (0, 0)),
                pl.BlockSpec((E, 1), lambda i: (0, 0)),
            ],
            out_specs=[
                pl.BlockSpec((E, tile_n), lambda i: (0, i)),
                pl.BlockSpec((TOP_K, tile_n), lambda i: (0, i)),
            ],
        ),
        compiler_params=pltpu.CompilerParams(**compiler_kwargs),
        cost_estimate=cost,
    )(x2, w2, b2)

    if expert_major_out:
        # Skip the wrapper transposes entirely when the consumer can take
        # expert-major gates / indices directly.
        return probs_t, idx_t

    probs = probs_t.T.reshape(B, T, E)
    idx = idx_t.T.reshape(B, T, TOP_K)
    return probs, idx


def _reference(x, w, b):
    """Pure-JAX reference mirroring the PyTorch forward."""
    logits = jnp.einsum("btd,ed->bte", x, w) + b
    E = logits.shape[-1]
    col = jax.lax.broadcasted_iota(jnp.int32, logits.shape, logits.ndim - 1)
    m1 = jnp.max(logits, axis=-1, keepdims=True)
    i1 = jnp.min(jnp.where(logits == m1, col, E), axis=-1, keepdims=True)
    masked = jnp.where(col == i1, -jnp.inf, logits)
    m2 = jnp.max(masked, axis=-1, keepdims=True)
    i2 = jnp.min(jnp.where(masked == m2, col, E), axis=-1, keepdims=True)
    keep = (col == i1) | (col == i2)
    sparse = jnp.where(keep, logits, -jnp.inf)
    probs = jax.nn.softmax(sparse, axis=-1)
    return probs, jnp.concatenate([i1, i2], axis=-1).astype(jnp.int32)


def _check(probs, idx, x, w, b, atol=1e-5):
    ref_p, ref_i = _reference(x, w, b)
    # Rows with near-tied logits are excluded from the exact comparison: the
    # kernel (MXU matmul, default precision) and the XLA reference may round
    # slightly differently and legitimately pick a different, equally valid expert.
    logits = jnp.einsum("btd,ed->bte", x, w) + b
    top3 = jax.lax.top_k(logits, 3)[0]
    safe = jnp.min(top3[..., :2] - top3[..., 1:], axis=-1) > 1e-4
    assert float(jnp.mean(safe.astype(jnp.float32))) > 0.5
    assert bool(jnp.all(jnp.where(safe[..., None], jnp.abs(probs - ref_p) <= atol, True)))
    assert bool(jnp.all(jnp.where(safe[..., None], idx == ref_i, True)))


if __name__ == "__main__":
    key = jax.random.PRNGKey(0)
    kx, kw, kb, kx2 = jax.random.split(key, 4)

    # Shapes from the PyTorch module: mh_output (4, 8, n_embed); Linear(128 -> 8).
    B, T = 4, 8
    x = jax.random.normal(kx, (B, T, N_EMBED), dtype=jnp.float32)

    bound = 1.0 / (N_EMBED ** 0.5)   # nn.Linear default init: U(-1/sqrt(D), 1/sqrt(D))
    w = jax.random.uniform(kw, (NUM_EXPERTS, N_EMBED), jnp.float32, -bound, bound)
    b = jax.random.uniform(kb, (NUM_EXPERTS,), jnp.float32, -bound, bound)

    probs, idx = topk_router(x, w, b)
    jax.block_until_ready((probs, idx))
    assert probs.shape == (B, T, NUM_EXPERTS)
    assert idx.shape == (B, T, TOP_K)
    assert probs.dtype == jnp.float32 and idx.dtype == jnp.int32
    _check(probs, idx, x, w, b)

    # Larger, non-128-multiple token count: exercises the un-padded ragged tail
    # and the >=2-grid-step split (N = 2600 -> tile_n = 1408, grid = (2,)).
    B2, T2 = 2, 1300
    x_big = jax.random.normal(kx2, (B2, T2, N_EMBED), dtype=jnp.float32)
    probs2, idx2 = topk_router(x_big, w, b)
    jax.block_until_ready((probs2, idx2))
    _check(probs2, idx2, x_big, w, b)

    # Small-tile override: multi-step pipelined grid with a ragged final block
    # (tile_n = 512, grid = (6,)).
    probs3, idx3 = topk_router(x_big, w, b, tile_n=512)
    jax.block_until_ready((probs3, idx3))
    _check(probs3, idx3, x_big, w, b)

    print("KERNEL_OK")
</pallas_src>

<mosaic_0001>
module attributes {stable_mosaic.version = 11 : i64} {
  func.func @topk_router_kernel(%arg0: i32, %arg1: memref<128x128xf32, #tpu.memory_space<vmem>>, %arg2: memref<8x128xf32, #tpu.memory_space<vmem>>, %arg3: memref<8x1xf32, #tpu.memory_space<vmem>>, %arg4: memref<8x128xf32, #tpu.memory_space<vmem>>, %arg5: memref<2x128xi32, #tpu.memory_space<vmem>>) attributes {dimension_semantics = [#tpu.dimension_semantics<parallel>], iteration_bounds = array<i64: 1>, scalar_prefetch = 0 : i64, scratch_operands = 0 : i64, tpu.core_type = #tpu.core_type<tc>, window_params = [{transform_indices = @transform_0, window_bounds = array<i64: 128, 128>}, {pipeline_mode = #tpu.pipeline_mode<synchronous>, transform_indices = @transform_1, window_bounds = array<i64: 8, 128>}, {pipeline_mode = #tpu.pipeline_mode<synchronous>, transform_indices = @transform_2, window_bounds = array<i64: 8, 1>}, {transform_indices = @transform_3, window_bounds = array<i64: 8, 128>}, {transform_indices = @transform_4, window_bounds = array<i64: 2, 128>}]} {
    %c0 = arith.constant 0 : index
    %c0_0 = arith.constant 0 : index
    %0 = vector.load %arg2[%c0, %c0_0] : memref<8x128xf32, #tpu.memory_space<vmem>>, vector<8x128xf32>
    %c0_1 = arith.constant 0 : index
    %c0_2 = arith.constant 0 : index
    %1 = vector.load %arg1[%c0_1, %c0_2] : memref<128x128xf32, #tpu.memory_space<vmem>>, vector<128x128xf32>
    %cst = arith.constant dense<0.000000e+00> : vector<8x128xf32>
    %2 = tpu.matmul %0, %1, %cst {dimension_numbers = #tpu.dot_dimension_numbers<[1], [1], [0], [0], [0, 0, 1, 0], [], []>} : vector<8x128xf32>, vector<128x128xf32>, vector<8x128xf32> -> vector<8x128xf32>
    %c0_3 = arith.constant 0 : index
    %c0_4 = arith.constant 0 : index
    %3 = vector.load %arg3[%c0_3, %c0_4] : memref<8x1xf32, #tpu.memory_space<vmem>>, vector<8x1xf32>
    %4 = vector.broadcast %3 : vector<8x1xf32> to vector<8x128xf32>
    %5 = arith.addf %2, %4 : vector<8x128xf32>
    %6 = tpu.iota {dimensions = array<i32: 0>} : vector<8x128xi32>
    %7 = arith.sitofp %6 : vector<8x128xi32> to vector<8x128xf32>
    %cst_5 = arith.constant dense<0xFF800000> : vector<128xf32>
    %8 = vector.multi_reduction <maximumf>, %5, %cst_5 [0] : vector<8x128xf32> to vector<128xf32>
    %9 = vector.shape_cast %8 : vector<128xf32> to vector<1x128xf32>
    %10 = vector.broadcast %9 : vector<1x128xf32> to vector<8x128xf32>
    %11 = arith.cmpf oeq, %5, %10 : vector<8x128xf32>
    %cst_6 = arith.constant 8.000000e+00 : f32
    %12 = vector.broadcast %cst_6 : f32 to vector<8x128xf32>
    %13 = arith.select %11, %7, %12 : vector<8x128xi1>, vector<8x128xf32>
    %cst_7 = arith.constant dense<0x7F800000> : vector<128xf32>
    %14 = vector.multi_reduction <minimumf>, %13, %cst_7 [0] : vector<8x128xf32> to vector<128xf32>
    %15 = vector.shape_cast %14 : vector<128xf32> to vector<1x128xf32>
    %16 = vector.broadcast %15 : vector<1x128xf32> to vector<8x128xf32>
    %17 = arith.cmpf oeq, %7, %16 : vector<8x128xf32>
    %cst_8 = arith.constant 0xFF800000 : f32
    %18 = vector.broadcast %cst_8 : f32 to vector<8x128xf32>
    %19 = arith.select %17, %18, %5 : vector<8x128xi1>, vector<8x128xf32>
    %cst_9 = arith.constant dense<0xFF800000> : vector<128xf32>
    %20 = vector.multi_reduction <maximumf>, %19, %cst_9 [0] : vector<8x128xf32> to vector<128xf32>
    %21 = vector.shape_cast %20 : vector<128xf32> to vector<1x128xf32>
    %22 = vector.broadcast %21 : vector<1x128xf32> to vector<8x128xf32>
    %23 = arith.cmpf oeq, %19, %22 : vector<8x128xf32>
    %cst_10 = arith.constant 8.000000e+00 : f32
    %24 = vector.broadcast %cst_10 : f32 to vector<8x128xf32>
    %25 = arith.select %23, %7, %24 : vector<8x128xi1>, vector<8x128xf32>
    %cst_11 = arith.constant dense<0x7F800000> : vector<128xf32>
    %26 = vector.multi_reduction <minimumf>, %25, %cst_11 [0] : vector<8x128xf32> to vector<128xf32>
    %27 = vector.shape_cast %26 : vector<128xf32> to vector<1x128xf32>
    %28 = arith.subf %21, %9 : vector<1x128xf32>
    %29 = math.exp %28 : vector<1x128xf32>
    %cst_12 = arith.constant 1.000000e+00 : f32
    %30 = vector.broadcast %cst_12 : f32 to vector<1x128xf32>
    %31 = arith.addf %30, %29 : vector<1x128xf32>
    %cst_13 = arith.constant 1.000000e+00 : f32
    %32 = vector.broadcast %cst_13 : f32 to vector<1x128xf32>
    %33 = arith.divf %32, %31 : vector<1x128xf32>
    %34 = arith.mulf %29, %33 : vector<1x128xf32>
    %35 = vector.broadcast %15 : vector<1x128xf32> to vector<8x128xf32>
    %36 = arith.cmpf oeq, %7, %35 : vector<8x128xf32>
    %37 = vector.broadcast %27 : vector<1x128xf32> to vector<8x128xf32>
    %38 = arith.cmpf oeq, %7, %37 : vector<8x128xf32>
    %cst_14 = arith.constant 0.000000e+00 : f32
    %39 = vector.shape_cast %34 : vector<1x128xf32> to vector<1x128xf32>
    %40 = vector.broadcast %39 : vector<1x128xf32> to vector<8x128xf32>
    %41 = vector.broadcast %cst_14 : f32 to vector<8x128xf32>
    %42 = arith.select %38, %40, %41 : vector<8x128xi1>, vector<8x128xf32>
    %43 = vector.shape_cast %33 : vector<1x128xf32> to vector<1x128xf32>
    %44 = vector.broadcast %43 : vector<1x128xf32> to vector<8x128xf32>
    %45 = arith.select %36, %44, %42 : vector<8x128xi1>, vector<8x128xf32>
    %c0_15 = arith.constant 0 : index
    %c0_16 = arith.constant 0 : index
    %46 = vector.load %arg4[%c0_15, %c0_16] : memref<8x128xf32, #tpu.memory_space<vmem>>, vector<8x128xf32>
    tpu.vector_store %arg4[%c0_15, %c0_16], %45 {strides = array<i32>} : memref<8x128xf32, #tpu.memory_space<vmem>>, vector<8x128xf32>,
    %47 = tpu.iota {dimensions = array<i32: 0>} : vector<2x128xi32>
    %c0_i32 = arith.constant 0 : i32
    %48 = vector.broadcast %c0_i32 : i32 to vector<2x128xi32>
    %49 = arith.cmpi eq, %47, %48 : vector<2x128xi32>
    %50 = vector.shape_cast %15 : vector<1x128xf32> to vector<1x128xf32>
    %51 = vector.broadcast %50 : vector<1x128xf32> to vector<2x128xf32>
    %52 = vector.shape_cast %27 : vector<1x128xf32> to vector<1x128xf32>
    %53 = vector.broadcast %52 : vector<1x128xf32> to vector<2x128xf32>
    %54 = arith.select %49, %51, %53 : vector<2x128xi1>, vector<2x128xf32>
    %55 = arith.fptosi %54 : vector<2x128xf32> to vector<2x128xi32>
    %c0_17 = arith.constant 0 : index
    %c0_18 = arith.constant 0 : index
    %56 = vector.load %arg5[%c0_17, %c0_18] : memref<2x128xi32, #tpu.memory_space<vmem>>, vector<2x128xi32>
    tpu.vector_store %arg5[%c0_17, %c0_18], %55 {strides = array<i32>} : memref<2x128xi32, #tpu.memory_space<vmem>>, vector<2x128xi32>,
    return
  }
  func.func @transform_0(%arg0: i32) -> (i32, i32) {
    %c0_i32 = arith.constant 0 : i32
    %c0_i32_0 = arith.constant 0 : i32
    return %arg0, %c0_i32 : i32, i32
  }
  func.func @transform_1(%arg0: i32) -> (i32, i32) {
    %c0_i32 = arith.constant 0 : i32
    %c0_i32_0 = arith.constant 0 : i32
    %c0_i32_1 = arith.constant 0 : i32
    return %c0_i32, %c0_i32_0 : i32, i32
  }
  func.func @transform_2(%arg0: i32) -> (i32, i32) {
    %c0_i32 = arith.constant 0 : i32
    %c0_i32_0 = arith.constant 0 : i32
    %c0_i32_1 = arith.constant 0 : i32
    return %c0_i32, %c0_i32_0 : i32, i32
  }
  func.func @transform_3(%arg0: i32) -> (i32, i32) {
    %c0_i32 = arith.constant 0 : i32
    %c0_i32_0 = arith.constant 0 : i32
    return %c0_i32, %arg0 : i32, i32
  }
  func.func @transform_4(%arg0: i32) -> (i32, i32) {
    %c0_i32 = arith.constant 0 : i32
    %c0_i32_0 = arith.constant 0 : i32
    return %c0_i32, %arg0 : i32, i32
  }
}

</mosaic_0001>

<bundles_post_ra>
// kernel: tpu_custom_call.1
= control target key start
LH: loop header
LB: loop body
LE: loop exit
PB: predicated region body
PF: predicated region fallthrough
CT: control target
= control target key end

     0   :  { %10 = vsyncpa [#allocation3], 0  ;;  %s321_s0 = inlined_call_operand.hbm [shape: f32[32,128], index: 0, kind: input, shape index: {}]   ;;  %s322_s1 = inlined_call_operand.vmem [shape: f32[8,128], index: 1, kind: input, shape index: {}]   ;;  %s323_s2 = inlined_call_operand.vmem [shape: f32[8,1], index: 2, kind: input, shape index: {}]   ;;  %s324_s3 = inlined_call_operand.hbm [shape: f32[8,32], index: 3, kind: output, shape index: {0}]   ;;  %s325_s4 = inlined_call_operand.hbm [shape: s32[2,32], index: 4, kind: output, shape index: {1}]  }
   0x1   :  { %11 = vsyncpa [#allocation4], 0 }
   0x2   :  { %12 = vsyncpa [#allocation7], 0 }
   0x3   :  { %16 = vsyncadd [#allocation3], 1536  ;;  %s17_s17 = sshll.u32 %s321_s0, 4  ;;  %s265_s18 = smov [#allocation2]   ;;  %s18_s17 = int_to_ptr.hbm [resolvable:$true] %s17_s17 }
   0x4   :  { %s19_s19 = sshll.u32 %s265_s18, 4  ;;  %s266_s20 = smov 128   ;;  %s20_s19 = int_to_ptr.vmem [resolvable:$true] %s19_s19 }
   0x5   :  { %s267_s21 = smov 8  }
   0x6   :  { %25 = dma.hbm_to_vmem [thread:$0]  %s18_s17, 512, %s20_s19, [#allocation3], %s266_s20, %s266_s20, %s267_s21  }
   0x7   :  { %259 = dma.done.wait [#allocation3], 2048  }
   0x8   :  { %260 = vsyncadd [#allocation3], 4294965248  ;;  %v50_v0 = vld [vmem:[#allocation2 + $0x78] sm:$0xff]  ;;  %v49_v1 = vld [vmem:[#allocation2 + $0x70] sm:$0xff]  ;;  %v268_v10 = vmov 0   ;;  %v77_v23 = vlaneseq  ;;  %s156_s27 = sshll.u32 %s325_s4, 4  ;;  %s157_s27 = int_to_ptr.hbm [resolvable:$true] %s156_s27 }
   0x9   :  { %57 = vmatpush.xpose.msra.mxu0 %v50_v0  ;;  %v48_v2 = vld [vmem:[#allocation2 + $0x68] sm:$0xff]  ;;  %v47_v3 = vld [vmem:[#allocation2 + $0x60] sm:$0xff]  ;;  %v46_v4 = vld [vmem:[#allocation2 + $0x58] sm:$0xff]  ;;  %182 = vset.pattern.permute.xlu0 %v268_v10  ;;  %s270_s4 = smov [#allocation5]   ;;  %s145_s5 = sshll.u32 %s324_s3, 4  ;;  %s146_s5 = int_to_ptr.hbm [resolvable:$true] %s145_s5 }
   0xa   :  { %v45_v5 = vld [vmem:[#allocation2 + $0x50] sm:$0xff]  ;;  %v44_v6 = vld [vmem:[#allocation2 + $0x48] sm:$0xff]  ;;  %v43_v7 = vld [vmem:[#allocation2 + $0x40] sm:$0xff]  ;;  %v78_v26 = vshrl.u32 %v77_v23, 7  ;;  %s143_s28 = sshll.u32 %s270_s4, 4  ;;  %s144_s28 = int_to_ptr.vmem [resolvable:$true] %s143_s28 }
   0xb   :  { %v42_v8 = vld [vmem:[#allocation2 + $0x38] sm:$0xff]  ;;  %v51_v9 = vld [vmem:[%s323_s2] sm:$0xff]  ;;  %v41_v11 = vld [vmem:[#allocation2 + $0x30] sm:$0xff] }
   0xc   :  { %54 = vperm.xlu0 %182, %v51_v9   ;;  %v40_v12 = vld [vmem:[#allocation2 + $0x28] sm:$0xff]  ;;  %v39_v13 = vld [vmem:[#allocation2 + $0x20] sm:$0xff]  ;;  %v38_v14 = vld [vmem:[#allocation2 + $0x18] sm:$0xff]  ;;  %v305_v29 = vcvt.s32.f32 %v78_v26  ;;  %vm134_vm3 = vcmp.eq.s32.totalorder %v78_v26, 0 }
   0xd   :  { %58 = vmatpush.xpose.msra.mxu0 %v49_v1  ;;  %v37_v15 = vld [vmem:[#allocation2 + $0x10] sm:$0xff]  ;;  %v36_v16 = vld [vmem:[#allocation2 + $0x8] sm:$0xff]  ;;  %v35_v17 = vld [vmem:[#allocation2] sm:$0xff] }
   0xe   :  { %v34_v18 = vld [vmem:[%s322_s1] sm:$0xff]  ;;  %s269_s1 = smov [#allocation6]  }
   0xf   :  { %s154_s24 = sshll.u32 %s269_s1, 4  ;;  %s155_s24 = int_to_ptr.vmem [resolvable:$true] %s154_s24 }
  0x11   :  { %59 = vmatpush.xpose.msra.mxu0 %v48_v2 }
  0x15   :  { %60 = vmatpush.xpose.msra.mxu0 %v47_v3 }
  0x19   :  { %61 = vmatpush.xpose.msra.mxu0 %v46_v4 }
  0x1d   :  { %62 = vmatpush.xpose.msra.mxu0 %v45_v5 }
  0x21   :  { %63 = vmatpush.xpose.msra.mxu0 %v44_v6 }
  0x25   :  { %64 = vmatpush.xpose.msra.mxu0 %v43_v7 }
  0x29   :  { %65 = vmatpush.xpose.msra.mxu0 %v42_v8 }
  0x2d   :  { %66 = vmatpush.xpose.msra.mxu0 %v41_v11 }
  0x31   :  { %67 = vmatpush.xpose.msra.mxu0 %v40_v12 }
  0x35   :  { %68 = vmatpush.xpose.msra.mxu0 %v39_v13 }
  0x39   :  { %69 = vmatpush.xpose.msra.mxu0 %v38_v14 }
  0x3d   :  { %70 = vmatpush.xpose.msra.mxu0 %v37_v15 }
  0x41   :  { %71 = vmatpush.xpose.msra.mxu0 %v36_v16 }
  0x45   :  { %72 = vmatpush.xpose.msra.mxu0 %v35_v17 }
  0x48   :  { %73 = vmatmul.f32.vlgmr.msra.gmra.mxu0 %v34_v18 }
  0x7e   :  { %v55_v19 = vpop.permute.xlu0 %54 }
  0xc5   :  { %v74_v20 = vpop.f32.mrf.mxu0 }
  0xc6   :  { %v75_v21 = vadd.f32 %v74_v20, %v55_v19 }
  0xc8   :  { %v80_v22 = vrot.slane %v75_v21, 4 }
  0xca   :  { %v81_v24 = vmax.f32 %v75_v21, %v80_v22 }
  0xcc   :  { %v82_v25 = vrot.slane %v81_v24, 2 }
  0xce   :  { %v83_v27 = vmax.f32 %v81_v24, %v82_v25 }
  0xd0   :  { %v84_v28 = vrot.slane %v83_v27, 1 }
  0xd2   :  { %v85_v30 = vmax.f32 %v83_v27, %v84_v28 }
  0xd4   :  { %vm86_vm0 = vcmp.eq.f32.partialorder %v75_v21, %v85_v30 }
  0xd5   :  { %v87_v31 = vsel %vm86_vm0, %v305_v29, 8.0 }
  0xd6   :  { %v88_v32 = vrot.slane %v87_v31, 4 }
  0xd8   :  { %v89_v33 = vmin.f32 %v87_v31, %v88_v32 }
  0xda   :  { %v90_v34 = vrot.slane %v89_v33, 2 }
  0xdc   :  { %v91_v35 = vmin.f32 %v89_v33, %v90_v34 }
  0xde   :  { %v92_v36 = vrot.slane %v91_v35, 1 }
  0xe0   :  { %v93_v37 = vmin.f32 %v91_v35, %v92_v36 }
  0xe2   :  { %vm94_vm1 = vcmp.eq.f32.partialorder %v305_v29, %v93_v37 }
  0xe3   :  { %v95_v38 = vsel %vm94_vm1, -inf, %v75_v21 }
  0xe4   :  { %v96_v39 = vrot.slane %v95_v38, 4 }
  0xe6   :  { %v97_v40 = vmax.f32 %v95_v38, %v96_v39 }
  0xe8   :  { %v98_v41 = vrot.slane %v97_v40, 2 }
  0xea   :  { %v99_v42 = vmax.f32 %v97_v40, %v98_v41 }
  0xec   :  { %v100_v43 = vrot.slane %v99_v42, 1 }
  0xee   :  { %v101_v44 = vmax.f32 %v99_v42, %v100_v43 }
  0xf0   :  { %vm102_vm2 = vcmp.eq.f32.partialorder %v95_v38, %v101_v44  ;;  %v110_v45 = vsub.f32 %v101_v44, %v85_v30 }
  0xf1   :  { %v103_v46 = vsel %vm102_vm2, %v305_v29, 8.0 }
  0xf2   :  { %v104_v47 = vrot.slane %v103_v46, 4  ;;  %v111_v48 = vmul.f32 1.442695, %v110_v45 }
  0xf4   :  { %v105_v49 = vmin.f32 %v103_v46, %v104_v47  ;;  %183 = vpow2.f32 %v111_v48 }
  0xf6   :  { %v106_v50 = vrot.slane %v105_v49, 2 }
  0xf8   :  { %v107_v51 = vmin.f32 %v105_v49, %v106_v50 }
  0xfa   :  { %v184_v52 = vpop.eup %183  ;;  %v108_v53 = vrot.slane %v107_v51, 1 }
  0xfb   :  { %v113_v54 = vadd.f32 1.0, %v184_v52 }
  0xfc   :  { %v109_v55 = vmin.f32 %v107_v51, %v108_v53 }
  0xfd   :  { %185 = vrcp.f32 %v113_v54  ;;  %v125_v0 = vand.u32 2147483648, %v113_v54  ;;  %v123_v2 = vand.u32 2147483647, %v113_v54  ;;  %vm119_vm6 = vweird.f32 %v113_v54 }
  0xfe   :  { %v135_v56 = vsel %vm134_vm3, %v93_v37, %v109_v55  ;;  %vm130_vm9 = vcmp.eq.f32.partialorder %v305_v29, %v109_v55 }
  0xff   :  { %vm171_vm4 = vcmp.lt.s32.totalorder %v135_v56, 0  ;;  %v172_v57 = vceil.f32 %v135_v56  ;;  %v173_v58 = vfloor.f32 %v135_v56  ;;  %v126_v4 = vor.u32 1.1754944e-38, %v125_v0 }
 0x100   :  { %vm124_vm8 = vcmp.eq.f32.partialorder %v123_v2, 8.507059e+37 }
 0x101   :  { %v174_v59 = vsel %vm171_vm4, %v172_v57, %v173_v58 }
 0x102   :  { %v175_v61 = vcvt.f32.s32 %v174_v59 }
 0x103   :  { %v186_v60 = vpop.eup %185 }
 0x104   :  { %v115_v62 = vmul.f32 %v186_v60, %v113_v54  ;;  %137 = vst [vmem:[#allocation6] sm:$0x3] %v175_v61  ;;  %vm120_vm5 = vweird.f32 %v186_v60 }
 0x105   :  { %159 = dma.vmem_to_hbm [thread:$0]  %s155_s24, 32, %s157_s27, [#allocation7]   ;;  %vm121_vm7 = vmor %vm119_vm6, %vm120_vm5 }
 0x106   :  { %v116_v63 = vsub.f32 1.0, %v115_v62 }
 0x108   :  { %v117_v1 = vmul.f32 %v186_v60, %v116_v63 }
 0x10a   :  { %v118_v3 = vadd.f32 %v186_v60, %v117_v1 }
 0x10c   :  { %v122_v5 = vsel %vm121_vm7, %v186_v60, %v118_v3 }
 0x10d   :  { %v127_v6 = vsel %vm124_vm8, %v126_v4, %v122_v5 }
 0x10e   :  { %v129_v7 = vmul.f32 %v184_v52, %v127_v6 }
 0x110   :  { %v131_v8 = vsel %vm130_vm9, %v129_v7, 0.0 }
 0x111   :  { %v132_v9 = vsel %vm94_vm1, %v127_v6, %v131_v8 }
 0x112   :  { %133 = vst [vmem:[#allocation5] sm:$0xff] %v132_v9 }
 0x113   :  { %148 = dma.vmem_to_hbm [thread:$0]  %s144_s28, 128, %s146_s5, [#allocation4]  }
 0x114   :  { %261 = dma.done.wait [#allocation4], 128  }
 0x115   :  { %262 = vsyncadd [#allocation4], 4294967168 }
 0x116   :  { %263 = dma.done.wait [#allocation7], 32  }
 0x117   :  { %264 = vsyncadd [#allocation7], 4294967264 }
 0x118   :  { %168 = vsyncpa [#allocation3], 1 }
 0x119   :  { %169 = vsyncpa [#allocation4], 1 }
 0x11a   :  { %170 = vsyncpa [#allocation7], 1 }

</bundles_post_ra>
